<compile_context>
chip_gen: v7x
topology: tpu7x:2x2x1
jax: 0.10.0
libtpu: 0.0.40
codegen_flags: <defaults>
</compile_context>

<pallas_src>
from typing import NamedTuple, Optional, Tuple

import jax
import jax.numpy as jnp
from jax.experimental import pallas as pl
from jax.experimental.pallas import tpu as pltpu


def _round_up(x, m):
    return (x + m - 1) // m * m


def _tpu_generation_defaults():
    """(tm, th, vmem_limit_bytes) tuned per TPU generation (roofline-based)."""
    try:
        kind = jax.devices()[0].device_kind.lower()
    except Exception:
        kind = ""
    if "v7" in kind:
        # 64 MiB VMEM per TC, 2 TCs/chip: favor tm (weight reuse) over th,
        # and leave headroom below physical VMEM for Mosaic scratch/DMA state.
        return 384, 512, 48 * 1024 * 1024
    if "v6" in kind:
        # 918 TF/s vs ~1.4 TB/s -> need large tm to be MXU-bound; big th amortizes
        # the ~0.35 us per-grid-step overhead. 128 MiB physical VMEM.
        return 512, 1024, 100 * 1024 * 1024
    if "v5" in kind:
        # 197 TF/s: already compute-bound around tm=256; keep tiles modest.
        return 256, 512, 96 * 1024 * 1024
    return 256, 512, None


def _vmem_estimate(tm, th, D, Cp, in_bytes):
    """Rough double-buffered VMEM footprint in bytes (worst case: f32 out + scratch)."""
    est = 0
    est += 2 * tm * D * in_bytes            # x tile
    est += 2 * D * (2 * th) * in_bytes      # packed w1||w2 block
    est += 2 * (2 * th) * 4                 # packed biases (f32)
    est += 2 * th * Cp * in_bytes           # w3 block
    est += 2 * Cp * 4                       # b3
    est += 2 * tm * Cp * 4                  # output tile
    est += tm * Cp * 4                      # acc scratch (worst case)
    est += 3 * tm * th * 4                  # f32 h1/h2/hidden temporaries
    return est


# ---------------------------------------------------------------------------
# Kernels
# ---------------------------------------------------------------------------

def _swiglu_kernel_f32out(x_ref, w12_ref, b12_ref, w3_ref, b3_ref, o_ref):
    """float32 output: accumulate directly into o_ref (resident across k axis)."""
    k = pl.program_id(1)
    th = w3_ref.shape[0]

    # One fused MXU matmul for both SwiGLU branches (f32 accumulation).
    h12 = jnp.dot(x_ref[...], w12_ref[...],
                  preferred_element_type=jnp.float32) + b12_ref[...]
    h1 = h12[:, :th]
    h2 = h12[:, th:]
    hidden = (h1 * jax.nn.sigmoid(h1)) * h2           # (tm, th) f32

    @pl.when(k == 0)
    def _():
        o_ref[...] = jnp.broadcast_to(b3_ref[...], o_ref.shape)

    o_ref[...] += jnp.dot(hidden.astype(w3_ref.dtype), w3_ref[...],
                          preferred_element_type=jnp.float32)


def _swiglu_kernel_scratch(x_ref, w12_ref, b12_ref, w3_ref, b3_ref, o_ref, acc_ref):
    """Narrow output dtype (e.g. bf16): accumulate in f32 VMEM scratch, cast at the end."""
    k = pl.program_id(1)
    th = w3_ref.shape[0]

    h12 = jnp.dot(x_ref[...], w12_ref[...],
                  preferred_element_type=jnp.float32) + b12_ref[...]
    h1 = h12[:, :th]
    h2 = h12[:, th:]
    hidden = (h1 * jax.nn.sigmoid(h1)) * h2

    @pl.when(k == 0)
    def _():
        acc_ref[...] = jnp.broadcast_to(b3_ref[...], acc_ref.shape)

    acc_ref[...] += jnp.dot(hidden.astype(w3_ref.dtype), w3_ref[...],
                            preferred_element_type=jnp.float32)

    @pl.when(k == pl.num_programs(1) - 1)
    def _():
        o_ref[...] = acc_ref[...].astype(o_ref.dtype)


# ---------------------------------------------------------------------------
# Wrapper
# ---------------------------------------------------------------------------

class SwigluParams(NamedTuple):
    w12: jax.Array            # (D, 2*Hp) packed [w1_chunk | w2_chunk] per hidden tile
    b12: jax.Array            # (1, 2*Hp) packed biases, f32
    w3: jax.Array             # (Hp, Cp)
    b3: jax.Array             # (1, Cp) f32
    dims: Tuple[int, ...]     # (D, H, C, Hp, Cp, th, tm_hint)
    vmem_limit: Optional[int]


def prepare_params(params, *, tm=None, th=None, compute_dtype=jnp.bfloat16,
                   vmem_limit_bytes=None) -> SwigluParams:
    """Pad, cast and pack the weights ONCE (hoisted out of the per-call hot path)."""
    w1, b1, w2, b2, w3, b3 = params
    D, H = w1.shape
    C = w3.shape[1]

    def_tm, def_th, def_vmem = _tpu_generation_defaults()
    tm = def_tm if tm is None else tm
    th = def_th if th is None else th
    vmem_limit = def_vmem if vmem_limit_bytes is None else vmem_limit_bytes

    Cp = _round_up(C, 128)
    th = max(128, min(th, _round_up(H, 128)))
    tm = max(8, _round_up(tm, 8))

    # Shrink tiles if the double-buffered footprint would not fit the VMEM budget.
    in_bytes = jnp.dtype(compute_dtype).itemsize
    if vmem_limit is not None:
        budget = int(vmem_limit * 0.9)
        while th > 128 and _vmem_estimate(tm, th, D, Cp, in_bytes) > budget:
            th //= 2
        while tm > 8 and _vmem_estimate(tm, th, D, Cp, in_bytes) > budget:
            tm //= 2

    Hp = _round_up(H, th)
    nk = Hp // th
    f32 = jnp.float32

    w1p = jnp.zeros((D, Hp), compute_dtype).at[:, :H].set(w1.astype(compute_dtype))
    w2p = jnp.zeros((D, Hp), compute_dtype).at[:, :H].set(w2.astype(compute_dtype))
    b1p = jnp.zeros((Hp,), f32).at[:H].set(b1.astype(f32))
    b2p = jnp.zeros((Hp,), f32).at[:H].set(b2.astype(f32))

    # Chunk-interleave so block k of width 2*th is [w1[:, k*th:(k+1)*th] | w2[:, ...]].
    w12 = jnp.concatenate([w1p.reshape(D, nk, th), w2p.reshape(D, nk, th)],
                          axis=2).reshape(D, 2 * Hp)
    b12 = jnp.concatenate([b1p.reshape(nk, th), b2p.reshape(nk, th)],
                          axis=1).reshape(1, 2 * Hp)

    w3p = jnp.zeros((Hp, Cp), compute_dtype).at[:H, :C].set(w3.astype(compute_dtype))
    b3p = jnp.zeros((1, Cp), f32).at[0, :C].set(b3.astype(f32))

    return SwigluParams(w12, b12, w3p, b3p, (D, H, C, Hp, Cp, th, tm), vmem_limit)


def swiglu_mlp_prepared(x, prep: SwigluParams):
    """x: (..., embed_dim) -> (..., num_classes), using pre-packed params."""
    D, H, C, Hp, Cp, th, tm_hint = prep.dims
    lead_shape = x.shape[:-1]
    x2d = x.reshape(-1, D)
    M = x2d.shape[0]

    compute_dtype = prep.w12.dtype
    tm = min(tm_hint, _round_up(max(M, 8), 8))   # only shrinks -> stays in VMEM budget
    Mp = _round_up(M, tm)

    xp = jnp.zeros((Mp, D), compute_dtype).at[:M].set(x2d.astype(compute_dtype))

    out_dtype = x.dtype
    f32_out = (out_dtype == jnp.float32)
    grid = (Mp // tm, Hp // th)

    in_specs = [
        pl.BlockSpec((tm, D), lambda i, k: (i, 0)),        # x tile (resident over k)
        pl.BlockSpec((D, 2 * th), lambda i, k: (0, k)),    # packed w1||w2 H-chunk
        pl.BlockSpec((1, 2 * th), lambda i, k: (0, k)),    # packed b1||b2 H-chunk
        pl.BlockSpec((th, Cp), lambda i, k: (k, 0)),       # w3 H-chunk
        pl.BlockSpec((1, Cp), lambda i, k: (0, 0)),        # b3 (constant)
    ]
    out_specs = pl.BlockSpec((tm, Cp), lambda i, k: (i, 0))

    if f32_out:
        kernel = _swiglu_kernel_f32out
        scratch_shapes = []
    else:
        kernel = _swiglu_kernel_scratch
        scratch_shapes = [pltpu.VMEM((tm, Cp), jnp.float32)]

    cp_kwargs = dict(dimension_semantics=("parallel", "arbitrary"))
    if prep.vmem_limit is not None:
        cp_kwargs["vmem_limit_bytes"] = int(prep.vmem_limit)

    out = pl.pallas_call(
        kernel,
        out_shape=jax.ShapeDtypeStruct((Mp, Cp), out_dtype),
        grid_spec=pltpu.PrefetchScalarGridSpec(
            num_scalar_prefetch=0,
            grid=grid,
            in_specs=in_specs,
            out_specs=out_specs,
            scratch_shapes=scratch_shapes,
        ),
        compiler_params=pltpu.CompilerParams(**cp_kwargs),
    )(xp, prep.w12, prep.b12, prep.w3, prep.b3)

    return out[:M, :C].reshape(*lead_shape, C)


def swiglu_mlp(x, params, *, tm=None, th=None, compute_dtype=jnp.bfloat16,
               vmem_limit_bytes=None):
    """Convenience wrapper: prepare + call (prefer prepare_params() once for reuse)."""
    prep = prepare_params(params, tm=tm, th=th, compute_dtype=compute_dtype,
                          vmem_limit_bytes=vmem_limit_bytes)
    return swiglu_mlp_prepared(x, prep)


# ---------------------------------------------------------------------------
# Reference + demo
# ---------------------------------------------------------------------------

def init_params(key, embed_dim, num_classes, dtype=jnp.float32):
    hidden = 4 * embed_dim
    k1, k2, k3, k4, k5, k6 = jax.random.split(key, 6)
    # Weights stored (in, out) — equivalent to torch Linear weight transposed.
    w1 = jax.random.normal(k1, (embed_dim, hidden), dtype) * 0.02
    b1 = jax.random.normal(k2, (hidden,), dtype) * 0.02
    w2 = jax.random.normal(k3, (embed_dim, hidden), dtype) * 0.02
    b2 = jax.random.normal(k4, (hidden,), dtype) * 0.02
    w3 = jax.random.normal(k5, (hidden, num_classes), dtype) * 0.02
    b3 = jax.random.normal(k6, (num_classes,), dtype) * 0.02
    return (w1, b1, w2, b2, w3, b3)


def reference(x, params):
    """Pure-JAX f32 reference for a sanity check."""
    w1, b1, w2, b2, w3, b3 = params
    h1 = x @ w1 + b1
    h2 = x @ w2 + b2
    hidden = (h1 * jax.nn.sigmoid(h1)) * h2
    return hidden @ w3 + b3


if __name__ == "__main__":
    key = jax.random.PRNGKey(0)
    kx, kp = jax.random.split(key)

    embed_dim = 32
    num_classes = 16
    batch, seq = 2, 8                      # 16 tokens total (exercises M padding)

    x = jax.random.normal(kx, (batch, seq, embed_dim), jnp.float32)
    params = init_params(kp, embed_dim, num_classes)
    y_ref = reference(x, params)

    # Fast path: bf16 operands, f32 MXU accumulation, f32 output (no scratch).
    prep_bf16 = prepare_params(params, compute_dtype=jnp.bfloat16)
    y = swiglu_mlp_prepared(x, prep_bf16)
    y = jax.block_until_ready(y)
    assert y.shape == (batch, seq, num_classes)
    assert jnp.allclose(y, y_ref, atol=2e-3, rtol=2e-2), "bf16 compute path mismatch"

    # Exact-semantics check: same kernel with f32 operands, tight tolerance.
    y32 = swiglu_mlp(x, params, compute_dtype=jnp.float32)
    y32 = jax.block_until_ready(y32)
    assert jnp.allclose(y32, y_ref, atol=1e-5, rtol=1e-5), "f32 compute path mismatch"

    # bf16 output path (exercises the scratch-accumulator kernel variant).
    ybf = swiglu_mlp_prepared(x.astype(jnp.bfloat16), prep_bf16)
    ybf = jax.block_until_ready(ybf)
    assert ybf.dtype == jnp.bfloat16
    assert jnp.allclose(ybf.astype(jnp.float32), y_ref, atol=2e-3, rtol=5e-2), \
        "bf16 output path mismatch"

    print("KERNEL_OK")
</pallas_src>

<mosaic_0001>
module attributes {stable_mosaic.version = 11 : i64} {
  func.func @_swiglu_kernel_f32out(%arg0: i32, %arg1: i32, %arg2: memref<16x32xbf16, #tpu.memory_space<vmem>>, %arg3: memref<32x256xbf16, #tpu.memory_space<vmem>>, %arg4: memref<1x256xf32, #tpu.memory_space<vmem>>, %arg5: memref<128x128xbf16, #tpu.memory_space<vmem>>, %arg6: memref<1x128xf32, #tpu.memory_space<vmem>>, %arg7: memref<16x128xf32, #tpu.memory_space<vmem>>) attributes {dimension_semantics = [#tpu.dimension_semantics<parallel>, #tpu.dimension_semantics<arbitrary>], iteration_bounds = array<i64: 1, 1>, scalar_prefetch = 0 : i64, scratch_operands = 0 : i64, tpu.core_type = #tpu.core_type<tc>, window_params = [{transform_indices = @transform_0, window_bounds = array<i64: 16, 32>}, {transform_indices = @transform_1, window_bounds = array<i64: 32, 256>}, {transform_indices = @transform_2, window_bounds = array<i64: 1, 256>}, {transform_indices = @transform_3, window_bounds = array<i64: 128, 128>}, {pipeline_mode = #tpu.pipeline_mode<synchronous>, transform_indices = @transform_4, window_bounds = array<i64: 1, 128>}, {transform_indices = @transform_5, window_bounds = array<i64: 16, 128>}]} {
    %c0 = arith.constant 0 : index
    %c0_0 = arith.constant 0 : index
    %0 = vector.load %arg2[%c0, %c0_0] : memref<16x32xbf16, #tpu.memory_space<vmem>>, vector<16x32xbf16>
    %c0_1 = arith.constant 0 : index
    %c0_2 = arith.constant 0 : index
    %1 = vector.load %arg3[%c0_1, %c0_2] : memref<32x256xbf16, #tpu.memory_space<vmem>>, vector<32x256xbf16>
    %cst = arith.constant dense<0.000000e+00> : vector<16x256xf32>
    %2 = tpu.matmul %0, %1, %cst {dimension_numbers = #tpu.dot_dimension_numbers<[1], [0], [0], [1], [0, 0, 1, 1], [], []>} : vector<16x32xbf16>, vector<32x256xbf16>, vector<16x256xf32> -> vector<16x256xf32>
    %c0_3 = arith.constant 0 : index
    %c0_4 = arith.constant 0 : index
    %3 = vector.load %arg4[%c0_3, %c0_4] : memref<1x256xf32, #tpu.memory_space<vmem>>, vector<1x256xf32>
    %4 = vector.broadcast %3 : vector<1x256xf32> to vector<16x256xf32>
    %5 = arith.addf %2, %4 : vector<16x256xf32>
    %6 = vector.extract_strided_slice %5 {offsets = [0, 0], sizes = [16, 128], strides = [1, 1]} : vector<16x256xf32> to vector<16x128xf32>
    %7 = vector.extract_strided_slice %5 {offsets = [0, 128], sizes = [16, 128], strides = [1, 1]} : vector<16x256xf32> to vector<16x128xf32>
    %8 = arith.negf %6 : vector<16x128xf32>
    %9 = math.exp %8 : vector<16x128xf32>
    %cst_5 = arith.constant 1.000000e+00 : f32
    %10 = vector.broadcast %cst_5 : f32 to vector<16x128xf32>
    %11 = arith.addf %10, %9 : vector<16x128xf32>
    %12 = arith.divf %10, %11 : vector<16x128xf32>
    %13 = arith.mulf %6, %12 : vector<16x128xf32>
    %14 = arith.mulf %13, %7 : vector<16x128xf32>
    %c0_i32 = arith.constant 0 : i32
    %15 = arith.cmpi eq, %arg1, %c0_i32 : i32
    %16 = arith.extui %15 : i1 to i32
    %c0_i32_6 = arith.constant 0 : i32
    %17 = arith.cmpi ne, %16, %c0_i32_6 : i32
    scf.if %17 {
      %c0_14 = arith.constant 0 : index
      %c0_15 = arith.constant 0 : index
      %24 = vector.load %arg6[%c0_14, %c0_15] : memref<1x128xf32, #tpu.memory_space<vmem>>, vector<1x128xf32>
      %25 = vector.shape_cast %24 : vector<1x128xf32> to vector<1x128xf32>
      %26 = vector.broadcast %25 : vector<1x128xf32> to vector<16x128xf32>
      %c0_16 = arith.constant 0 : index
      %c0_17 = arith.constant 0 : index
      %27 = vector.load %arg7[%c0_16, %c0_17] : memref<16x128xf32, #tpu.memory_space<vmem>>, vector<16x128xf32>
      tpu.vector_store %arg7[%c0_16, %c0_17], %26 {strides = array<i32>} : memref<16x128xf32, #tpu.memory_space<vmem>>, vector<16x128xf32>,
    } else {
    }
    %c0_7 = arith.constant 0 : index
    %c0_8 = arith.constant 0 : index
    %18 = vector.load %arg7[%c0_7, %c0_8] : memref<16x128xf32, #tpu.memory_space<vmem>>, vector<16x128xf32>
    %19 = arith.truncf %14 : vector<16x128xf32> to vector<16x128xbf16>
    %c0_9 = arith.constant 0 : index
    %c0_10 = arith.constant 0 : index
    %20 = vector.load %arg5[%c0_9, %c0_10] : memref<128x128xbf16, #tpu.memory_space<vmem>>, vector<128x128xbf16>
    %cst_11 = arith.constant dense<0.000000e+00> : vector<16x128xf32>
    %21 = tpu.matmul %19, %20, %cst_11 {dimension_numbers = #tpu.dot_dimension_numbers<[1], [0], [0], [1], [0, 0, 1, 1], [], []>} : vector<16x128xbf16>, vector<128x128xbf16>, vector<16x128xf32> -> vector<16x128xf32>
    %22 = arith.addf %18, %21 : vector<16x128xf32>
    %c0_12 = arith.constant 0 : index
    %c0_13 = arith.constant 0 : index
    %23 = vector.load %arg7[%c0_12, %c0_13] : memref<16x128xf32, #tpu.memory_space<vmem>>, vector<16x128xf32>
    tpu.vector_store %arg7[%c0_12, %c0_13], %22 {strides = array<i32>} : memref<16x128xf32, #tpu.memory_space<vmem>>, vector<16x128xf32>,
    return
  }
  func.func @transform_0(%arg0: i32, %arg1: i32) -> (i32, i32) {
    %c0_i32 = arith.constant 0 : i32
    %c0_i32_0 = arith.constant 0 : i32
    return %arg0, %c0_i32 : i32, i32
  }
  func.func @transform_1(%arg0: i32, %arg1: i32) -> (i32, i32) {
    %c0_i32 = arith.constant 0 : i32
    %c0_i32_0 = arith.constant 0 : i32
    return %c0_i32, %arg1 : i32, i32
  }
  func.func @transform_2(%arg0: i32, %arg1: i32) -> (i32, i32) {
    %c0_i32 = arith.constant 0 : i32
    %c0_i32_0 = arith.constant 0 : i32
    return %c0_i32, %arg1 : i32, i32
  }
  func.func @transform_3(%arg0: i32, %arg1: i32) -> (i32, i32) {
    %c0_i32 = arith.constant 0 : i32
    %c0_i32_0 = arith.constant 0 : i32
    return %arg1, %c0_i32 : i32, i32
  }
  func.func @transform_4(%arg0: i32, %arg1: i32) -> (i32, i32) {
    %c0_i32 = arith.constant 0 : i32
    %c0_i32_0 = arith.constant 0 : i32
    %c0_i32_1 = arith.constant 0 : i32
    return %c0_i32, %c0_i32_0 : i32, i32
  }
  func.func @transform_5(%arg0: i32, %arg1: i32) -> (i32, i32) {
    %c0_i32 = arith.constant 0 : i32
    %c0_i32_0 = arith.constant 0 : i32
    return %arg0, %c0_i32 : i32, i32
  }
}

</mosaic_0001>

<bundles_post_ra>
// kernel: tpu_custom_call.1
= control target key start
LH: loop header
LB: loop body
LE: loop exit
PB: predicated region body
PF: predicated region fallthrough
CT: control target
= control target key end

     0   :  { %10 = vsyncpa [#allocation3], 0  ;;  %s587_s0 = inlined_call_operand.hbm [shape: bf16[16,32], index: 0, kind: input, shape index: {}]   ;;  %s588_s1 = inlined_call_operand.hbm [shape: bf16[32,256], index: 1, kind: input, shape index: {}]   ;;  %s589_s2 = inlined_call_operand.vmem [shape: f32[1,256], index: 2, kind: input, shape index: {}]   ;;  %s590_s3 = inlined_call_operand.hbm [shape: bf16[128,128], index: 3, kind: input, shape index: {}]   ;;  %s591_s4 = inlined_call_operand.vmem [shape: f32[1,128], index: 4, kind: input, shape index: {}]   ;;  %s592_s5 = inlined_call_operand.hbm [shape: f32[16,128], index: 5, kind: output, shape index: {}]  }
   0x1   :  { %11 = vsyncpa [#allocation6], 0 }
   0x2   :  { %12 = vsyncpa [#allocation4], 0  ;;  %s486_s18 = smov [#allocation5]   ;;  %s392_s22 = scalar_lea.hbm %s588_s1, 512 }
   0x3   :  { %s30_s19 = sshll.u32 %s486_s18, 4  ;;  %p393_p0 = scmp.ne.s32.totalorder %s588_s1, %s392_s22  ;;  %s31_s19 = int_to_ptr.vmem [resolvable:$true] %s30_s19 }
   0x4   :  { %p396_p1 = scmp.lt.u32.totalorder %s392_s22, %s588_s1 }
   0x6   :  { %p398_p2 = pnand %p396_p1, %p393_p0 }
   0x8   :  { %401 = shalt.err (!%p398_p2)
}
   0x9   :  { %s402_s27 = scalar_lea.vmem %s31_s19, 512  ;;  %p407_p4 = scmp.lt.s32.totalorder %s31_s19, %s31_s19 }
   0xa   :  { %p403_p3 = scmp.ne.s32.totalorder %s31_s19, %s402_s27  ;;  %p408_p5 = scmp.lt.s32.totalorder %s402_s27, %s402_s27 }
   0xc   :  { %p409_p6 = por %p408_p5, %p407_p4 }
   0xe   :  { %p410_p7 = pnand %p409_p6, %p403_p3 }
  0x10   :  { %413 = shalt.err (!%p410_p7)
}
  0x11   :  { %s487_s28 = smov 128   ;;  %s488_s29 = smov 8  }
  0x12   :  { %36 = dma.hbm_to_vmem [thread:$0]  %s588_s1, 512, %s31_s19, [#allocation6], %s487_s28, %s487_s28, %s488_s29  }
  0x13   :  { %s489_s7 = smov [#allocation2]   ;;  %s414_s11 = scalar_lea.hbm %s587_s0, 128 }
  0x14   :  { %s18_s8 = sshll.u32 %s489_s7, 4  ;;  %p415_p8 = scmp.ne.s32.totalorder %s587_s0, %s414_s11  ;;  %s19_s8 = int_to_ptr.vmem [resolvable:$true] %s18_s8 }
  0x15   :  { %p418_p9 = scmp.lt.u32.totalorder %s414_s11, %s587_s0 }
  0x17   :  { %p420_p10 = pnand %p418_p9, %p415_p8 }
  0x19   :  { %423 = shalt.err (!%p420_p10)
}
  0x1a   :  { %s424_s16 = scalar_lea.vmem %s19_s8, 128  ;;  %p429_p12 = scmp.lt.s32.totalorder %s19_s8, %s19_s8 }
  0x1b   :  { %p425_p11 = scmp.ne.s32.totalorder %s19_s8, %s424_s16  ;;  %p430_p13 = scmp.lt.s32.totalorder %s424_s16, %s424_s16 }
  0x1d   :  { %p431_p0 = por %p430_p13, %p429_p12 }
  0x1f   :  { %p432_p1 = pnand %p431_p0, %p425_p11 }
  0x21   :  { %435 = shalt.err (!%p432_p1)
}
  0x22   :  { %s490_s1 = smov 64   ;;  %s491_s17 = smov 4  }
  0x23   :  { %24 = dma.hbm_to_vmem [thread:$0]  %s587_s0, 128, %s19_s8, [#allocation3], %s490_s1, %s490_s1, %s491_s17  }
  0x24   :  { %s492_s20 = smov [#allocation7]   ;;  %s436_s24 = scalar_lea.hbm %s590_s3, 1024 }
  0x25   :  { %s44_s21 = sshll.u32 %s492_s20, 4  ;;  %p437_p2 = scmp.ne.s32.totalorder %s590_s3, %s436_s24  ;;  %s45_s21 = int_to_ptr.vmem [resolvable:$true] %s44_s21 }
  0x26   :  { %p440_p3 = scmp.lt.u32.totalorder %s436_s24, %s590_s3 }
  0x28   :  { %p442_p4 = pnand %p440_p3, %p437_p2 }
  0x2a   :  { %445 = shalt.err (!%p442_p4)
}
  0x2b   :  { %s446_s6 = scalar_lea.vmem %s45_s21, 1024  ;;  %p451_p6 = scmp.lt.s32.totalorder %s45_s21, %s45_s21 }
  0x2c   :  { %p447_p5 = scmp.ne.s32.totalorder %s45_s21, %s446_s6  ;;  %p452_p7 = scmp.lt.s32.totalorder %s446_s6, %s446_s6 }
  0x2e   :  { %p453_p8 = por %p452_p7, %p451_p6 }
  0x30   :  { %p454_p9 = pnand %p453_p8, %p447_p5 }
  0x32   :  { %457 = shalt.err (!%p454_p9)
}
  0x33   :  { %50 = dma.hbm_to_vmem [thread:$0]  %s590_s3, 1024, %s45_s21, [#allocation6], %s490_s1, %s490_s1, %s491_s17  }
  0x34   :  { %480 = dma.done.wait [#allocation3], 128  }
  0x35   :  { %481 = vsyncadd [#allocation3], 4294967168 }
  0x36   :  { %482 = dma.done.wait [#allocation6], 1536  }
  0x37   :  { %483 = vsyncadd [#allocation6], 4294965760  ;;  %v493_v0 = vmov 0   ;;  %v369_v1 = vld [vmem:[#allocation5 + $0x4] ss:$8 sps:$4 sm:$0xff]   ;;  %vm106_vm0 = vcmask 261120   ;;  %v71_v15 = vlaneseq }
  0x38   :  { %142 = vmatprep.mubr.bf16.mxu0 %v493_v0  ;;  %v371_v2 = vld [vmem:[#allocation5] ss:$8 sps:$4 sm:$0xff]   ;;  %110 = vmatprep.subr.bf16.mxu0 %v369_v1  ;;  %v372_v3 = vld [vmem:[#allocation5 + $0x14] ss:$8 sps:$4 sm:$0xff]   ;;  %v374_v4 = vld [vmem:[#allocation5 + $0x10] ss:$8 sps:$4 sm:$0xff]  }
  0x39   :  { %111 = vmatpush1.bf16.msra.mxu0 %v371_v2  ;;  %v375_v5 = vld [vmem:[#allocation2] sm:$0xff]   ;;  %v376_v6 = vld [vmem:[#allocation7] sm:$0xff]   ;;  %v494_v7 = vmov 0.0   ;;  %v377_v8 = vld [vmem:[#allocation7 + $0x8] sm:$0xff]   ;;  %vm495_vm1 = vmmov 0   ;;  %v72_v16 = vshrl.u32 %v71_v15, 7 }
  0x3a   :  { %112 = vmatprep.subr.bf16.mxu0 %v372_v3  ;;  %338 = vmatprep.subr.bf16.mxu1 %v494_v7  ;;  %v378_v9 = vld [vmem:[#allocation7 + $0x10] sm:$0xff]   ;;  %v379_v10 = vld [vmem:[#allocation7 + $0x18] sm:$0xff]   ;;  %v380_v11 = vld [vmem:[#allocation7 + $0x20] sm:$0xff]   ;;  %s496_s10 = smov [#allocation8]  }
  0x3b   :  { %339 = vmatpush3.bf16.msra.mxu1 %v376_v6  ;;  %v381_v12 = vld [vmem:[#allocation7 + $0x28] sm:$0xff]   ;;  %v382_v13 = vld [vmem:[#allocation7 + $0x30] sm:$0xff]   ;;  %v383_v14 = vld [vmem:[#allocation7 + $0x38] sm:$0xff]   ;;  %354 = vmatprep.mubr.msk.bf16.mxu1 %vm495_vm1, %v494_v7  ;;  %v73_v17 = vsub.s32 0, %v72_v16  ;;  %v77_v32 = vsub.s32 1, %v72_v16  ;;  %s299_s11 = sshll.u32 %s496_s10, 4  ;;  %s300_s11 = int_to_ptr.vmem [resolvable:$true] %s299_s11 }
  0x3c   :  { %340 = vmatprep.subr.bf16.mxu1 %v494_v7  ;;  %v69_v18 = vld [vmem:[%s589_s2] sm:$0x3]  ;;  %s458_s12 = scalar_lea.vmem %s300_s11, 256  ;;  %p463_p11 = scmp.lt.s32.totalorder %s300_s11, %s300_s11 }
  0x3d   :  { %113 = vmatpush1.bf16.msra.mxu0 %v374_v4  ;;  %v74_v19 = vrot.slane %v69_v18, %v73_v17  ;;  %v78_v33 = vrot.slane %v69_v18, %v77_v32  ;;  %v320_v43 = vld [vmem:[%s591_s4] ss:$0 sm:$0xff]  ;;  %p459_p10 = scmp.ne.s32.totalorder %s300_s11, %s458_s12  ;;  %p464_p12 = scmp.lt.s32.totalorder %s458_s12, %s458_s12 }
  0x3f   :  { %341 = vmatpush3.bf16.msra.mxu1 %v377_v8  ;;  %p465_p13 = por %p464_p12, %p463_p11 }
  0x40   :  { %317 = vmatmul.mubr.msk.bf16.vlgmr.msra.gmra.mrb[0].mxu0 %vm106_vm0, %v375_v5  ;;  %342 = vmatprep.subr.bf16.mxu1 %v494_v7 }
  0x41   :  { %p466_p0 = pnand %p465_p13, %p459_p10 }
  0x43   :  { %343 = vmatpush3.bf16.msra.mxu1 %v378_v9 }
  0x44   :  { %344 = vmatprep.subr.bf16.mxu1 %v494_v7 }
  0x47   :  { %345 = vmatpush3.bf16.msra.mxu1 %v379_v10 }
  0x48   :  { %346 = vmatprep.subr.bf16.mxu1 %v494_v7 }
  0x4b   :  { %347 = vmatpush3.bf16.msra.mxu1 %v380_v11 }
  0x4c   :  { %348 = vmatprep.subr.bf16.mxu1 %v494_v7 }
  0x4f   :  { %349 = vmatpush3.bf16.msra.mxu1 %v381_v12 }
  0x50   :  { %350 = vmatprep.subr.bf16.mxu1 %v494_v7 }
  0x53   :  { %351 = vmatpush3.bf16.msra.mxu1 %v382_v13 }
  0x54   :  { %352 = vmatprep.subr.bf16.mxu1 %v494_v7 }
  0x57   :  { %353 = vmatpush3.bf16.msra.mxu1 %v383_v14 }
 0x113   :  { %v144_v20 = vpop.f32.mrb[0].mxu0 }
 0x114   :  { %v145_v21 = vadd.f32 %v144_v20, %v74_v19  ;;  %v146_v22 = vpop.f32.mrb[1].mxu0 }
 0x115   :  { %v148_v23 = vpop.f32.mrb[2].mxu0  ;;  %v147_v36 = vadd.f32 %v146_v22, %v78_v33 }
 0x116   :  { %v318_v24 = vmul.f32 -1.442695, %v145_v21  ;;  %v149_v25 = vadd.f32 %v148_v23, %v74_v19  ;;  %v150_v26 = vpop.f32.mrb[3].mxu0 }
 0x117   :  { %v151_v40 = vadd.f32 %v150_v26, %v78_v33 }
 0x118   :  { %384 = vpow2.f32 %v318_v24  ;;  %v319_v27 = vmul.f32 -1.442695, %v149_v25 }
 0x11a   :  { %386 = vpow2.f32 %v319_v27 }
 0x122   :  { %v385_v28 = vpop.eup %384 }
 0x123   :  { %v159_v29 = vadd.f32 1.0, %v385_v28 }
 0x124   :  { %v387_v30 = vpop.eup %386 }
 0x125   :  { %388 = vrcp.f32 %v159_v29  ;;  %v160_v31 = vadd.f32 1.0, %v387_v30 }
 0x127   :  { %390 = vrcp.f32 %v160_v31 }
 0x12f   :  { %v389_v34 = vpop.eup %388 }
 0x130   :  { %v165_v35 = vmul.f32 %v389_v34, %v145_v21 }
 0x131   :  { %v391_v37 = vpop.eup %390 }
 0x132   :  { %v167_v38 = vmul.f32 %v165_v35, %v147_v36  ;;  %v166_v39 = vmul.f32 %v391_v37, %v149_v25 }
 0x134   :  { %v168_v41 = vmul.f32 %v166_v39, %v151_v40 }
 0x136   :  { %v184_v42 = vpack.c.bf16 %v168_v41, %v167_v38 }
 0x138   :  { %355 = vmatmul.mubr.bf16.vlgmr.msra.gmra.mrb[0].mxu1 %v184_v42 }
 0x20b   :  { %v283_v44 = vpop.f32.mrb[0].mxu1 }
 0x20c   :  { %v290_v45 = vadd.f32 %v320_v43, %v283_v44  ;;  %v356_v46 = vpop.f32.mrb[1].mxu1 }
 0x20d   :  { %v286_v47 = vpop.f32.mrb[2].mxu1 }
 0x20e   :  { %292 = vst [vmem:[#allocation8] sm:$0xff] %v290_v45  ;;  %v291_v48 = vadd.f32 %v320_v43, %v286_v47  ;;  %v357_v49 = vpop.f32.mrb[3].mxu1 }
 0x210   :  { %293 = vst [vmem:[#allocation8 + $0x8] sm:$0xff] %v291_v48 }
 0x211   :  { %469 = shalt.err (!%p466_p0)
}
 0x212   :  { %s470_s14 = scalar_lea.hbm %s592_s5, 256 }
 0x213   :  { %p471_p1 = scmp.ne.s32.totalorder %s592_s5, %s470_s14  ;;  %p474_p2 = scmp.lt.u32.totalorder %s470_s14, %s592_s5 }
 0x215   :  { %p476_p3 = pnand %p474_p2, %p471_p1 }
 0x217   :  { %479 = shalt.err (!%p476_p3)
}
 0x218   :  { %305 = dma.vmem_to_hbm [thread:$0]  %s300_s11, 256, %s592_s5, [#allocation4], %s487_s28, %s487_s28, %s488_s29  }
 0x219   :  { %484 = dma.done.wait [#allocation4], 256  }
 0x21a   :  { %485 = vsyncadd [#allocation4], 4294967040 }
 0x21b   :  { %309 = vsyncpa [#allocation3], 1 }
 0x21c   :  { %310 = vsyncpa [#allocation6], 1 }
 0x21d   :  { %311 = vsyncpa [#allocation4], 1 }

</bundles_post_ra>
